<compile_context>
chip_gen: v7x
topology: tpu7x:2x2x1
jax: 0.10.0
libtpu: 0.0.40
codegen_flags: <defaults>
</compile_context>

<pallas_src>
import jax
import jax.numpy as jnp
from jax.experimental import pallas as pl
from jax.experimental.pallas import tpu as pltpu

_LANE = 128
# Cap for ONE streamed int8 adjacency tile (double-buffered x2 plus the
# transient f32 widening x4 still fits comfortably under 32 MiB scoped VMEM).
_ADJ_TILE_BYTES = 2 * 1024 * 1024


def _cdiv(a, b):
    return -(-a // b)


def _round_up(n, m):
    return _cdiv(n, m) * m


def _choose_tiles(n):
    """Pick (tn, n_cols, tk, n_rows) for streaming an [n, n] adjacency."""
    n_lane = _round_up(max(n, _LANE), _LANE)

    # Destination (output-column) tile: large and lane-dense, but keep >= 2
    # column blocks when n allows it (megacore sharding across v7x's 2 TCs).
    tn = _LANE
    for cand in (1024, 512, 256):
        if n_lane >= 2 * cand:
            tn = cand
            break
    n_cols = _round_up(n_lane, tn)

    # Contraction (source-row) tile: as large as n / the VMEM budget allows,
    # with the k steps balanced so row padding stays small.  Multiples of 128
    # also satisfy the int8 minimum (32, 128) tile.
    tk_max = max(_LANE, (_ADJ_TILE_BYTES // tn) // _LANE * _LANE)
    k_steps = _cdiv(n_lane, tk_max)
    tk = _round_up(_cdiv(n_lane, k_steps), _LANE)
    n_rows = tk * k_steps
    return tn, n_cols, tk, n_rows


def _gcn_aggregate_kernel(hs_ref, dinv_ref, adjt_ref, out_ref):
    """One (column-tile j, contraction-tile k) step of out = dinv ⊙ (hs @ A~^T).

    hs_ref   : [1, TK]  f32   source-normalized projected features dinv*(x @ W^T)
    dinv_ref : [1, TN]  f32   destination-side D^{-1/2}
    adjt_ref : [TK, TN] int8  A~^T tile (small-integer edge multiplicities)
    out_ref  : [1, TN]  f32   lane-dense output row; its block index is
                              invariant in k, so it stays VMEM-resident and
                              doubles as the f32 accumulator.
    """
    k = pl.program_id(1)

    @pl.when(k == 0)
    def _init():
        out_ref[...] = jnp.zeros_like(out_ref)

    # int8 -> f32 widen on the VPU: required by the int8 HBM storage (the big
    # bandwidth win) and essentially free under the tile's DMA; it keeps the
    # LHS / accumulation in exact f32 instead of casting hs down to bf16.
    out_ref[...] += jnp.dot(
        hs_ref[...],
        adjt_ref[...].astype(jnp.float32),
        preferred_element_type=jnp.float32,
    )

    @pl.when(k == pl.num_programs(1) - 1)
    def _finalize():
        out_ref[...] *= dinv_ref[...]


def _build_padded_adjacency_t(edge_index, num_nodes, n_rows, n_cols):
    """A~^T ([source, target], int8, pre-padded) and D^{-1/2} in single passes.

    add_remaining_self_loops semantics: existing self-loops are dropped and
    every node gets exactly one weight-1 self-loop.  Duplicate non-self edges
    accumulate (matches PyG scatter-add); exact in int8 up to 127 duplicates.
    """
    src = edge_index[0].astype(jnp.int32)
    dst = edge_index[1].astype(jnp.int32)
    non_loop = src != dst

    # O(E) degree on the target index (+1 for the added self-loop); deg >= 1.
    deg = jnp.zeros((num_nodes,), jnp.float32).at[dst].add(
        non_loop.astype(jnp.float32)) + 1.0
    dinv = 1.0 / jnp.sqrt(deg)

    # One scatter straight into the padded buffer, already in the streamed dtype.
    loop = jnp.arange(num_nodes, dtype=jnp.int32)
    rows = jnp.concatenate([src, loop])
    cols = jnp.concatenate([dst, loop])
    vals = jnp.concatenate(
        [non_loop.astype(jnp.int8), jnp.ones((num_nodes,), jnp.int8)])
    a_t = jnp.zeros((n_rows, n_cols), jnp.int8).at[rows, cols].add(vals)
    return a_t, dinv


@jax.jit
def simple_gnn_forward(x, edge_index, weight):
    """Pallas-TPU forward of SimpleGNN.

    x: [N, F] float, edge_index: [2, E] int, weight: [1, F] float.
    Returns: [N] float32 == GCNConv(F, 1, bias=False)(x, edge_index).squeeze(-1).
    """
    n = x.shape[0]
    tn, n_cols, tk, n_rows = _choose_tiles(n)

    a_t, dinv = _build_padded_adjacency_t(edge_index, n, n_rows, n_cols)

    # Tiny [N,F]@[F,1] projection GEMV + source-side normalization done once in
    # the wrapper (O(N*F)), not once per output tile.
    h = jnp.dot(x.astype(jnp.float32), weight.astype(jnp.float32).T)[:, 0]
    hs = dinv * h

    hs_row = jnp.zeros((1, n_rows), jnp.float32).at[0, :n].set(hs)
    dinv_row = jnp.zeros((1, n_cols), jnp.float32).at[0, :n].set(dinv)

    grid = (n_cols // tn, n_rows // tk)  # (parallel j, reduction k last)

    out = pl.pallas_call(
        _gcn_aggregate_kernel,
        out_shape=jax.ShapeDtypeStruct((1, n_cols), jnp.float32),
        grid=grid,
        in_specs=[
            pl.BlockSpec((1, tk), lambda j, k: (0, k)),    # hs   (source side)
            pl.BlockSpec((1, tn), lambda j, k: (0, j)),    # dinv (dest side)
            pl.BlockSpec((tk, tn), lambda j, k: (k, j)),   # A~^T int8 tile
        ],
        out_specs=pl.BlockSpec((1, tn), lambda j, k: (0, j)),
        compiler_params=pltpu.CompilerParams(
            dimension_semantics=("parallel", "arbitrary"),
            vmem_limit_bytes=32 * 1024 * 1024,
        ),
    )(hs_row, dinv_row, a_t)

    return out[0, :n]


if __name__ == "__main__":
    key = jax.random.PRNGKey(0)
    k_x, k_w = jax.random.split(key)

    # NOTE: at this size the kernel is pure launch/padding overhead; the Pallas
    # path pays off for N in the hundreds+ (kept small per the test contract).
    N = 16          # number of nodes
    F_IN = 8        # num_node_features

    x = jax.random.normal(k_x, (N, F_IN), dtype=jnp.float32)

    # deterministic bidirectional ring graph: edges (i, i+1) and (i+1, i)
    src = jnp.arange(N, dtype=jnp.int32)
    dst = (src + 1) % N
    edge_index = jnp.stack(
        [jnp.concatenate([src, dst]), jnp.concatenate([dst, src])], axis=0
    )  # [2, 2N]

    # GCNConv's internal Linear(in=F_IN, out=1, bias=False): weight shape [1, F_IN]
    weight = jax.random.normal(k_w, (1, F_IN), dtype=jnp.float32) / jnp.sqrt(F_IN)

    out = simple_gnn_forward(x, edge_index, weight)
    jax.block_until_ready(out)

    # pure-JAX f32 reference: Â @ (x @ W^T), Â = D^{-1/2} (A + I) D^{-1/2}
    s, d = edge_index[0], edge_index[1]
    non_loop = (s != d).astype(jnp.float32)
    a = jnp.zeros((N, N), jnp.float32).at[d, s].add(non_loop) + jnp.eye(
        N, dtype=jnp.float32)
    deg_ref = a.sum(axis=1)
    dinv_ref = 1.0 / jnp.sqrt(deg_ref)
    a_hat = dinv_ref[:, None] * a * dinv_ref[None, :]
    ref = a_hat @ jnp.dot(x, weight.T)[:, 0]

    assert out.shape == (N,)
    assert jnp.allclose(out, ref, atol=1e-5, rtol=1e-5), (
        f"max abs err {jnp.max(jnp.abs(out - ref))}")

    print("KERNEL_OK")
</pallas_src>

<mosaic_0001>
module attributes {stable_mosaic.version = 11 : i64} {
  func.func private @main(%arg0: i32) attributes {dimension_semantics = [#tpu.dimension_semantics<core_parallel>], iteration_bounds = array<i64: 2>, tpu.core_type = #tpu.core_type<sc_scalar_subcore>, window_params = []} {
    return
  }
}

module attributes {stable_mosaic.version = 11 : i64} {
  func.func private @main(%arg0: i32) attributes {dimension_semantics = [#tpu.dimension_semantics<core_parallel>], iteration_bounds = array<i64: 2>, tpu.core_type = #tpu.core_type<sc_scalar_subcore>, window_params = []} {
    return
  }
}

module attributes {stable_mosaic.version = 11 : i64} {
  func.func @_gcn_aggregate_kernel(%arg0: i32, %arg1: i32, %arg2: memref<1x128xf32, #tpu.memory_space<vmem>>, %arg3: memref<1x128xf32, #tpu.memory_space<vmem>>, %arg4: memref<128x128xi8, #tpu.memory_space<vmem>>, %arg5: memref<1x128xf32, #tpu.memory_space<vmem>>) attributes {dimension_semantics = [#tpu.dimension_semantics<parallel>, #tpu.dimension_semantics<arbitrary>], iteration_bounds = array<i64: 1, 1>, scalar_prefetch = 0 : i64, scratch_operands = 0 : i64, tpu.core_type = #tpu.core_type<tc>, window_params = [{transform_indices = @transform_0, window_bounds = array<i64: 1, 128>}, {transform_indices = @transform_1, window_bounds = array<i64: 1, 128>}, {transform_indices = @transform_2, window_bounds = array<i64: 128, 128>}, {transform_indices = @transform_3, window_bounds = array<i64: 1, 128>}]} {
    %c0_i32 = arith.constant 0 : i32
    %0 = arith.cmpi eq, %arg1, %c0_i32 : i32
    %1 = arith.extui %0 : i1 to i32
    %c0_i32_0 = arith.constant 0 : i32
    %2 = arith.cmpi ne, %1, %c0_i32_0 : i32
    scf.if %2 {
      %cst_10 = arith.constant 0.000000e+00 : f32
      %13 = vector.broadcast %cst_10 : f32 to vector<1x128xf32>
      %c0_11 = arith.constant 0 : index
      %c0_12 = arith.constant 0 : index
      %14 = vector.load %arg5[%c0_11, %c0_12] : memref<1x128xf32, #tpu.memory_space<vmem>>, vector<1x128xf32>
      tpu.vector_store %arg5[%c0_11, %c0_12], %13 {strides = array<i32>} : memref<1x128xf32, #tpu.memory_space<vmem>>, vector<1x128xf32>,
    } else {
    }
    %c0 = arith.constant 0 : index
    %c0_1 = arith.constant 0 : index
    %3 = vector.load %arg5[%c0, %c0_1] : memref<1x128xf32, #tpu.memory_space<vmem>>, vector<1x128xf32>
    %c0_2 = arith.constant 0 : index
    %c0_3 = arith.constant 0 : index
    %4 = vector.load %arg2[%c0_2, %c0_3] : memref<1x128xf32, #tpu.memory_space<vmem>>, vector<1x128xf32>
    %c0_4 = arith.constant 0 : index
    %c0_5 = arith.constant 0 : index
    %5 = vector.load %arg4[%c0_4, %c0_5] : memref<128x128xi8, #tpu.memory_space<vmem>>, vector<128x128xi8>
    %6 = arith.sitofp %5 : vector<128x128xi8> to vector<128x128xf32>
    %cst = arith.constant dense<0.000000e+00> : vector<1x128xf32>
    %7 = tpu.matmul %4, %6, %cst {dimension_numbers = #tpu.dot_dimension_numbers<[1], [0], [0], [1], [0, 0, 1, 1], [], []>} : vector<1x128xf32>, vector<128x128xf32>, vector<1x128xf32> -> vector<1x128xf32>
    %8 = arith.addf %3, %7 : vector<1x128xf32>
    %c0_6 = arith.constant 0 : index
    %c0_7 = arith.constant 0 : index
    %9 = vector.load %arg5[%c0_6, %c0_7] : memref<1x128xf32, #tpu.memory_space<vmem>>, vector<1x128xf32>
    tpu.vector_store %arg5[%c0_6, %c0_7], %8 {strides = array<i32>} : memref<1x128xf32, #tpu.memory_space<vmem>>, vector<1x128xf32>,
    %c0_i32_8 = arith.constant 0 : i32
    %10 = arith.cmpi eq, %arg1, %c0_i32_8 : i32
    %11 = arith.extui %10 : i1 to i32
    %c0_i32_9 = arith.constant 0 : i32
    %12 = arith.cmpi ne, %11, %c0_i32_9 : i32
    scf.if %12 {
      %c0_10 = arith.constant 0 : index
      %c0_11 = arith.constant 0 : index
      %13 = vector.load %arg5[%c0_10, %c0_11] : memref<1x128xf32, #tpu.memory_space<vmem>>, vector<1x128xf32>
      %c0_12 = arith.constant 0 : index
      %c0_13 = arith.constant 0 : index
      %14 = vector.load %arg3[%c0_12, %c0_13] : memref<1x128xf32, #tpu.memory_space<vmem>>, vector<1x128xf32>
      %15 = arith.mulf %13, %14 : vector<1x128xf32>
      %c0_14 = arith.constant 0 : index
      %c0_15 = arith.constant 0 : index
      %16 = vector.load %arg5[%c0_14, %c0_15] : memref<1x128xf32, #tpu.memory_space<vmem>>, vector<1x128xf32>
      tpu.vector_store %arg5[%c0_14, %c0_15], %15 {strides = array<i32>} : memref<1x128xf32, #tpu.memory_space<vmem>>, vector<1x128xf32>,
    } else {
    }
    return
  }
  func.func @transform_0(%arg0: i32, %arg1: i32) -> (i32, i32) {
    %c0_i32 = arith.constant 0 : i32
    %c0_i32_0 = arith.constant 0 : i32
    return %c0_i32, %arg1 : i32, i32
  }
  func.func @transform_1(%arg0: i32, %arg1: i32) -> (i32, i32) {
    %c0_i32 = arith.constant 0 : i32
    %c0_i32_0 = arith.constant 0 : i32
    return %c0_i32, %arg0 : i32, i32
  }
  func.func @transform_2(%arg0: i32, %arg1: i32) -> (i32, i32) {
    %c0_i32 = arith.constant 0 : i32
    return %arg1, %arg0 : i32, i32
  }
  func.func @transform_3(%arg0: i32, %arg1: i32) -> (i32, i32) {
    %c0_i32 = arith.constant 0 : i32
    %c0_i32_0 = arith.constant 0 : i32
    return %c0_i32, %arg0 : i32, i32
  }
}

</mosaic_0001>

<bundles_post_ra>
// kernel: simple_gnn_forward.1
= control target key start
LH: loop header
LB: loop body
LE: loop exit
PB: predicated region body
PF: predicated region fallthrough
CT: control target
= control target key end

     0   :  { %v278_v0 = vmov 0.0|0.0   ;;  %v279_v2 = vmov 0.0   ;;  %vm280_vm0 = vmmov 0   ;;  %s334_s2 = inlined_call_operand.vmem [shape: s8[128,128], index: 2, kind: input, shape index: {}]   ;;  %s335_s3 = inlined_call_operand.vmem [shape: f32[1,128], index: 3, kind: output, shape index: {}]   ;;  %s336_s0 = inlined_call_operand.vmem [shape: f32[1,128], index: 0, kind: input, shape index: {}]   ;;  %s337_s1 = inlined_call_operand.vmem [shape: f32[1,128], index: 1, kind: input, shape index: {}]  }
   0x1   :  { %236 = vmatprep.subr.bf16.mxu0 %v278_v0  ;;  %v153_v1 = vld [vmem:[%s334_s2] sm:$0xff]   ;;  %18 = vst [vmem:[%s335_s3] sm:$0x1] %v279_v2  ;;  %233 = vmatprep.mubr.msk.f32.mxu0 %vm280_vm0, %v279_v2  ;;  %v261_v5 = vld [vmem:[%s334_s2 + $0x8] sm:$0xff]   ;;  %v263_v8 = vld [vmem:[%s334_s2 + $0x10] sm:$0xff]  }
   0x2   :  { %v267_v3 = vunpack.c.l.s8.bf16 %v153_v1  ;;  %v268_v4 = vunpack.c.h.s8.bf16 %v153_v1  ;;  %v269_v6 = vunpack.c.l.s8.bf16 %v261_v5  ;;  %v270_v7 = vunpack.c.h.s8.bf16 %v261_v5  ;;  %v265_v11 = vld [vmem:[%s334_s2 + $0x18] sm:$0xff]   ;;  %v20_v14 = vld [vmem:[%s336_s0] sm:$0x1] }
   0x3   :  { %v271_v9 = vunpack.c.l.s8.bf16 %v263_v8  ;;  %v272_v10 = vunpack.c.h.s8.bf16 %v263_v8  ;;  %v273_v12 = vunpack.c.l.s8.bf16 %v265_v11  ;;  %v274_v13 = vunpack.c.h.s8.bf16 %v265_v11  ;;  %v145_v19 = vld [vmem:[%s337_s1] sm:$0x1] }
   0x4   :  { %238 = vmatpush3.bf16.msra.mxu0 %v267_v3 }
   0x5   :  { %239 = vmatprep.subr.bf16.mxu0 %v278_v0 }
   0x8   :  { %241 = vmatpush3.bf16.msra.mxu0 %v268_v4  ;;  %v19_v15 = vld [vmem:[%s335_s3] sm:$0x1] }
   0x9   :  { %242 = vmatprep.subr.bf16.mxu0 %v278_v0 }
   0xc   :  { %244 = vmatpush3.bf16.msra.mxu0 %v269_v6 }
   0xd   :  { %245 = vmatprep.subr.bf16.mxu0 %v278_v0 }
  0x10   :  { %247 = vmatpush3.bf16.msra.mxu0 %v270_v7 }
  0x11   :  { %248 = vmatprep.subr.bf16.mxu0 %v278_v0 }
  0x14   :  { %250 = vmatpush3.bf16.msra.mxu0 %v271_v9 }
  0x15   :  { %251 = vmatprep.subr.bf16.mxu0 %v278_v0 }
  0x18   :  { %253 = vmatpush3.bf16.msra.mxu0 %v272_v10 }
  0x19   :  { %254 = vmatprep.subr.bf16.mxu0 %v278_v0 }
  0x1c   :  { %256 = vmatpush3.bf16.msra.mxu0 %v273_v12 }
  0x1d   :  { %257 = vmatprep.subr.bf16.mxu0 %v278_v0 }
  0x20   :  { %259 = vmatpush3.bf16.msra.mxu0 %v274_v13 }
  0x23   :  { %234 = vmatmul.mubr.f32.vlgmr.msra.gmra.mrb[0].mxu0 %v20_v14 }
  0xf6   :  { %v135_v16 = vpop.f32.mrb[0].mxu0 }
  0xf7   :  { %v139_v17 = vadd.f32 %v135_v16, %v19_v15  ;;  %v235_v18 = vpop.f32.mrb[1].mxu0 }
  0xf9   :  { %140 = vst [vmem:[%s335_s3] sm:$0x1] %v139_v17 }
 0x100   :  { %v144_v20 = vld [vmem:[%s335_s3] sm:$0x1] }
 0x101   :  { %v146_v21 = vmul.f32 %v145_v19, %v144_v20 }
 0x103   :  { %147 = vst [vmem:[%s335_s3] sm:$0x1] %v146_v21 }

</bundles_post_ra>
